<compile_context>
chip_gen: v7x
topology: tpu7x:2x2x1
jax: 0.10.0
libtpu: 0.0.40
codegen_flags: <defaults>
</compile_context>

<pallas_src>
import math

import jax
import jax.numpy as jnp
from jax.experimental import pallas as pl
from jax.experimental.pallas import tpu as pltpu


def _dma_flatten_kernel(x_ref, o_ref, sem):
    # Single contiguous HBM->HBM DMA.  Both refs live in HBM (pl.ANY), have
    # identical shape/layout, and cover the full arrays, so this lowers to one
    # contiguous transfer at HBM bandwidth with zero VMEM usage.
    cp = pltpu.make_async_copy(x_ref, o_ref, sem)
    cp.start()
    cp.wait()


def flatten_pallas(x):
    """Equivalent of torch.flatten(x, start_dim=1) for any >=1-D input."""
    n = x.shape[0]
    f = math.prod(x.shape[1:]) if x.ndim > 1 else 1

    # Zero-cost metadata reshape into the flattened (N, F) view.  Row-major
    # order is preserved, matching torch.flatten semantics; XLA lowers this to
    # a bitcast for default layouts, so no extra HBM copy is materialized.
    x2d = jnp.reshape(x, (n, f))

    return pl.pallas_call(
        _dma_flatten_kernel,
        out_shape=jax.ShapeDtypeStruct((n, f), x.dtype),
        in_specs=[pl.BlockSpec(memory_space=pl.ANY)],
        out_specs=pl.BlockSpec(memory_space=pl.ANY),
        scratch_shapes=[pltpu.SemaphoreType.DMA(())],
    )(x2d)


if __name__ == "__main__":
    key = jax.random.PRNGKey(0)
    # Small NCHW input consistent with the ONNX-importer flatten test.
    x = jax.random.normal(key, (2, 4, 16, 16), dtype=jnp.float32)

    y = flatten_pallas(x)
    jax.block_until_ready(y)

    # Correctness check against the reference semantics.
    ref = jnp.reshape(x, (x.shape[0], -1))
    assert y.shape == (2, 4 * 16 * 16), y.shape
    assert y.dtype == x.dtype
    assert bool(jnp.array_equal(y, ref))

    print("KERNEL_OK")
</pallas_src>

<mosaic_0001>
module attributes {stable_mosaic.version = 11 : i64} {
  func.func @_dma_flatten_kernel(%arg0: memref<2x1024xf32, #tpu.memory_space<any>>, %arg1: memref<2x1024xf32, #tpu.memory_space<any>>, %arg2: memref<!tpu.dma_semaphore, #tpu.memory_space<semaphore_mem>>) attributes {dimension_semantics = [], scalar_prefetch = 0 : i64, scratch_operands = 1 : i64, tpu.core_type = #tpu.core_type<tc>} {
    tpu.enqueue_dma source(%arg0 : memref<2x1024xf32, #tpu.memory_space<any>>) target(%arg1 : memref<2x1024xf32, #tpu.memory_space<any>>) target_semaphore(%arg2 : memref<!tpu.dma_semaphore, #tpu.memory_space<semaphore_mem>>)
    tpu.wait_dma2 semaphore(%arg2 : memref<!tpu.dma_semaphore, #tpu.memory_space<semaphore_mem>>) src(%arg0 : memref<2x1024xf32, #tpu.memory_space<any>>) dst(%arg1 : memref<2x1024xf32, #tpu.memory_space<any>>)
    return
  }
}

</mosaic_0001>

<bundles_post_ra>
// kernel: tpu_custom_call.1
= control target key start
LH: loop header
LB: loop body
LE: loop exit
PB: predicated region body
PF: predicated region fallthrough
CT: control target
= control target key end

     0   :  { %s35_s6 = smov [#allocation2]   ;;  %s36_s7 = smov [#allocation3]   ;;  %s54_s0 = inlined_call_operand.hbm [shape: f32[2,1024], index: 0, kind: input, shape index: {}]   ;;  %s55_s1 = inlined_call_operand.hbm [shape: f32[2,1024], index: 1, kind: output, shape index: {}]  }
   0x1   :  { %s37_s8 = smov 0  }
   0x2   :  { %18 = dma.general %s54_s0, 256, %s55_s1, %s35_s6, %s36_s7, [#allocation4], %s37_s8, 0  }
   0x3   :  { %33 = dma.done.wait [#allocation2], 256 }
   0x4   :  { %34 = vsyncadd [#allocation2], 4294967040 }
   0x5   :  { %23 = vsyncmov [#allocation2] }
   0x8   :  { %s24_s13 = vpop.sfrf %23 }
   0x9   :  { %p29_p0 = scmp.ne.s32.totalorder %s24_s13, 0 }
   0xb   :  { %28 = shalt.err (%p29_p0)  }

</bundles_post_ra>
